<compile_context>
chip_gen: v5e
topology: v5e:2x2
jax: 0.10.0
libtpu: 0.0.40
codegen_flags: <defaults>
</compile_context>

<pallas_src>
import functools

import jax
import jax.numpy as jnp
from jax.experimental import pallas as pl
from jax.experimental.pallas import tpu as pltpu


# ----------------------------------------------------------------------------
# Fused kernel
# ----------------------------------------------------------------------------
def _fused_gcn_vae_kernel(
    # inputs
    pw_ref,       # (1,)      f32  SMEM : pos_weight
    adj_ref,      # (N,N) or (tm,N) bf16 : normalized adjacency (resident or row tile)
    feat_ref,     # (N, F)    bf16       : node features (resident)
    labels_ref,   # (tm, N)   bf16       : row tile of dense {0,1} labels
    eps_ref,      # (N, H2)   f32        : N(0,1) noise (resident)
    w0_ref,       # (F, H1)   bf16
    wms_ref,      # (H1,2*H2) bf16       : fused [Wm | Ws]
    # outputs
    zmean_ref,    # (N, H2)   f32        : resident (constant block index)
    cost_ref,     # (1,)      f32  SMEM
    acc_ref,      # (1,)      f32  SMEM
    loglike_ref,  # (1,)      f32  SMEM
    # scratch
    xw0_s,        # (N, H1)   bf16       : features @ W0 (hoisted)
    h1_s,         # (N, H1)   f32        : hidden1
    h1wms_s,      # (N, 2*H2) bf16       : hidden1 @ [Wm|Ws] (hoisted)
    z_s,          # (N, H2)   f32        : sampled latent (decoder operand)
    sums_s,       # (3,)      f32  SMEM  : [bce_sum, correct_sum, kl_sum]
    *, tm, n, h2, adj_resident,
):
    p = pl.program_id(0)              # phase
    i = pl.program_id(1)              # row-tile index
    num_tiles = pl.num_programs(1)
    row0 = pl.multiple_of(i * tm, tm)

    def adj_rows():
        # Resident adj: slice rows out of the single VMEM copy (streamed once).
        if adj_resident:
            return adj_ref[pl.ds(row0, tm), :]
        return adj_ref[...]

    # ------------------ phase 0: hidden1 rows ------------------
    @pl.when(p == 0)
    def _phase0():
        @pl.when(i == 0)
        def _init():
            # Hoisted tiny-K (K = F) matmul, done once and kept resident.
            xw0_s[...] = jnp.dot(
                feat_ref[...], w0_ref[...], preferred_element_type=jnp.float32
            ).astype(xw0_s.dtype)
            sums_s[0] = jnp.float32(0.0)
            sums_s[1] = jnp.float32(0.0)
            sums_s[2] = jnp.float32(0.0)

        # Dominant MXU matmul: K = N, bf16 operands, f32 accumulation.
        h = jnp.dot(adj_rows(), xw0_s[...], preferred_element_type=jnp.float32)
        h1_s[pl.ds(row0, tm), :] = jnp.maximum(h, 0.0)

    # ---- phase 1: z_mean / z_std rows, reparameterization, KL partials ----
    @pl.when(p == 1)
    def _phase1():
        @pl.when(i == 0)
        def _proj():
            # Single fused projection hidden1 @ [Wm|Ws] (tiny K = H1), hoisted.
            h1wms_s[...] = jnp.dot(
                h1_s[...], wms_ref[...], preferred_element_type=jnp.float32
            ).astype(h1wms_s.dtype)

        # One adj matmul of output width 2*H2 instead of two width-H2 matmuls.
        zms = jnp.dot(adj_rows(), h1wms_s[...], preferred_element_type=jnp.float32)
        z_mean = zms[:, :h2]
        z_std = zms[:, h2:]
        eps = eps_ref[pl.ds(row0, tm), :]
        z = z_mean + eps * jnp.exp(z_std)

        zmean_ref[pl.ds(row0, tm), :] = z_mean
        z_s[pl.ds(row0, tm), :] = z

        # KL partial: sum(1 + 2*z_std - z_mean^2 - exp(2*z_std)) over this tile.
        kl_tile = jnp.sum(1.0 + 2.0 * z_std - z_mean * z_mean - jnp.exp(2.0 * z_std))
        sums_s[2] = sums_s[2] + kl_tile

    # --------- phase 2: decoder logits + BCE loss + accuracy ---------
    @pl.when(p == 2)
    def _phase2():
        z_rows = z_s[pl.ds(row0, tm), :]
        # logits tile = z_rows @ z.T (contract latent axes; z resident, K = H2).
        logits = jax.lax.dot_general(
            z_rows, z_s[...],
            dimension_numbers=(((1,), (1,)), ((), ())),
            preferred_element_type=jnp.float32,
        )                                                       # (tm, N)
        # NOTE(synk): when labels == support(adj_norm) (this setup), the labels
        # stream could be dropped entirely and y computed as (adj_rows() > 0);
        # kept as an explicit input to preserve general module semantics.
        y = labels_ref[...].astype(jnp.float32)
        pw = pw_ref[0]

        # Stable BCEWithLogits with pos_weight:
        #   softplus(-x) = max(-x,0) + log1p(exp(-|x|)); softplus(x) = softplus(-x) + x
        sp_neg = jnp.maximum(-logits, 0.0) + jnp.log1p(jnp.exp(-jnp.abs(logits)))
        sp_pos = sp_neg + logits
        loss = pw * y * sp_neg + (1.0 - y) * sp_pos

        # sigmoid(x) >= 0.5  <=>  x >= 0 ; labels are {0,1}.
        correct = ((logits >= 0.0) == (y >= 0.5)).astype(jnp.float32)

        sums_s[0] = sums_s[0] + jnp.sum(loss)
        sums_s[1] = sums_s[1] + jnp.sum(correct)

        @pl.when(i == num_tiles - 1)
        def _finalize():
            inv_n2 = jnp.float32(1.0 / float(n * n))
            bce_mean = sums_s[0] * inv_n2
            # 0.5/N * mean_rows(sum_cols(.)) == 0.5 * total_sum / N^2
            kl = 0.5 * sums_s[2] * inv_n2
            loglike_ref[0] = bce_mean
            cost_ref[0] = bce_mean - kl
            acc_ref[0] = sums_s[1] * inv_n2


# ----------------------------------------------------------------------------
# VMEM-aware planning: pick row tile + whether adj can be resident in VMEM.
# ----------------------------------------------------------------------------
def _plan_tiling(n, f, h1, h2):
    try:
        vmem_cap = int(pltpu.get_tpu_info().vmem_capacity_bytes)
    except Exception:
        vmem_cap = 64 << 20          # conservative (v7x physical)
    budget = int(vmem_cap * 0.75)    # leave ~25% headroom for compiler temps
    headroom = 2 << 20

    # Residents independent of adj placement / tile size (bytes).
    fixed = (
        n * f * 2                    # features (bf16)
        + n * h2 * 4                 # eps (f32)
        + (f * h1 + h1 * 2 * h2) * 2 # W0, [Wm|Ws] (bf16)
        + n * h2 * 4                 # z_mean output (f32, resident)
        + n * h1 * 2                 # xw0 scratch (bf16)
        + n * h1 * 4                 # hidden1 scratch (f32)
        + n * 2 * h2 * 2             # hidden1 @ [Wm|Ws] scratch (bf16)
        + n * h2 * 4                 # z scratch (f32)
    )

    def footprint(tm, adj_resident):
        labels_buf = 2 * tm * n * 2                            # double-buffered bf16
        adj_bytes = n * n * 2 if adj_resident else 2 * tm * n * 2
        return fixed + labels_buf + adj_bytes + headroom

    if n <= 512:
        cands = [n]
    else:
        cands = [t for t in (1024, 512, 256, 128, 64, 32, 16, 8) if n % t == 0] or [n]

    # Prefer adj-resident (stream adj once) with the largest tile that fits,
    # then fall back to streamed adj.
    for adj_resident in (True, False):
        for tm in cands:
            need = footprint(tm, adj_resident)
            if need <= budget:
                return tm, adj_resident, need, vmem_cap
    return cands[-1], False, None, vmem_cap


# ----------------------------------------------------------------------------
# Wrapper
# ----------------------------------------------------------------------------
def gcn_vae_forward(features, adj, labels_dense, eps, w0, wm, ws, pos_weight):
    n, f = features.shape
    h1 = w0.shape[1]
    h2 = wm.shape[1]
    tm, adj_resident, need, vmem_cap = _plan_tiling(n, f, h1, h2)
    assert n % tm == 0
    num_tiles = n // tm

    # bf16 MXU operands (f32 accumulation on every dot); loss/KL math stays f32.
    # Casts below are NO-OPS when callers pre-cast (casts hoisted out of hot path).
    cdt = jnp.bfloat16
    adj_c = adj.astype(cdt)
    feat_c = features.astype(cdt)
    w0_c = w0.astype(cdt)
    wms_c = jnp.concatenate(
        [wm.astype(cdt), ws.astype(cdt)], axis=1
    )                                          # fused [Wm | Ws], (H1, 2*H2)
    labels_c = labels_dense.astype(cdt)        # {0,1} exactly representable in bf16
    eps_f = eps.astype(jnp.float32)
    pw = jnp.asarray([pos_weight], dtype=jnp.float32)

    vmem_limit = None
    if need is not None and need > (16 << 20):
        vmem_limit = int(min(need + (4 << 20), vmem_cap))

    kernel = functools.partial(
        _fused_gcn_vae_kernel, tm=tm, n=n, h2=h2, adj_resident=adj_resident
    )

    if adj_resident:
        # adj streamed from HBM exactly once; kept resident in VMEM.
        adj_spec = pl.BlockSpec((n, n), lambda p, i: (0, 0))
    else:
        # Row tiles in phases 0/1; frozen to the last-used block in phase 2
        # so the p=1 -> p=2 boundary does not trigger a redundant DMA.
        adj_spec = pl.BlockSpec(
            (tm, n),
            lambda p, i: (i * (p < 2) + (num_tiles - 1) * (p >= 2), 0),
        )

    grid_spec = pltpu.PrefetchScalarGridSpec(
        num_scalar_prefetch=0,
        grid=(3, num_tiles),
        in_specs=[
            pl.BlockSpec(memory_space=pltpu.MemorySpace.SMEM),              # pos_weight
            adj_spec,                                                        # adj
            pl.BlockSpec((n, f), lambda p, i: (0, 0)),                       # features (resident)
            # labels rows: only needed in phase 2 -> stay on block 0 otherwise
            pl.BlockSpec((tm, n), lambda p, i: (i * (p == 2), 0)),
            pl.BlockSpec((n, h2), lambda p, i: (0, 0)),                      # eps (resident)
            pl.BlockSpec((f, h1), lambda p, i: (0, 0)),                      # W0
            pl.BlockSpec((h1, 2 * h2), lambda p, i: (0, 0)),                 # [Wm|Ws]
        ],
        out_specs=(
            pl.BlockSpec((n, h2), lambda p, i: (0, 0)),                      # z_mean (resident)
            pl.BlockSpec(memory_space=pltpu.MemorySpace.SMEM),               # cost
            pl.BlockSpec(memory_space=pltpu.MemorySpace.SMEM),               # accuracy
            pl.BlockSpec(memory_space=pltpu.MemorySpace.SMEM),               # log_like
        ),
        scratch_shapes=[
            pltpu.VMEM((n, h1), cdt),              # xw0 (bf16: MXU operand, K=N dot)
            pltpu.VMEM((n, h1), jnp.float32),      # hidden1 (f32: feeds tiny projection)
            pltpu.VMEM((n, 2 * h2), cdt),          # hidden1 @ [Wm|Ws] (bf16: MXU operand)
            pltpu.VMEM((n, h2), jnp.float32),      # z (f32: decoder operand, K=H2 only)
            pltpu.SMEM((3,), jnp.float32),         # partial sums
        ],
    )

    zmean, cost, acc, loglike = pl.pallas_call(
        kernel,
        out_shape=(
            jax.ShapeDtypeStruct((n, h2), jnp.float32),
            jax.ShapeDtypeStruct((1,), jnp.float32),
            jax.ShapeDtypeStruct((1,), jnp.float32),
            jax.ShapeDtypeStruct((1,), jnp.float32),
        ),
        grid_spec=grid_spec,
        compiler_params=pltpu.CompilerParams(
            # Phases share VMEM/SMEM scratch and the row steps accumulate into it,
            # so both grid axes must stay on one core -> "arbitrary".
            dimension_semantics=("arbitrary", "arbitrary"),
            vmem_limit_bytes=vmem_limit,
        ),
    )(pw, adj_c, feat_c, labels_c, eps_f, w0_c, wms_c)

    return cost[0], acc[0], zmean, loglike[0]


# ----------------------------------------------------------------------------
# Pure-JAX reference (f32) for a tolerance sanity check
# ----------------------------------------------------------------------------
def _reference_forward(features, adj, labels, eps, w0, wm, ws, pos_weight):
    n = features.shape[0]
    h1 = jax.nn.relu(adj @ (features @ w0))
    z_mean = adj @ (h1 @ wm)
    z_std = adj @ (h1 @ ws)
    z = z_mean + eps * jnp.exp(z_std)
    logits = z @ z.T
    y = labels
    sp_neg = jnp.maximum(-logits, 0.0) + jnp.log1p(jnp.exp(-jnp.abs(logits)))
    sp_pos = sp_neg + logits
    loss = pos_weight * y * sp_neg + (1.0 - y) * sp_pos
    bce = jnp.mean(loss)
    kl = 0.5 / n * jnp.mean(
        jnp.sum(1.0 + 2.0 * z_std - z_mean**2 - jnp.exp(2.0 * z_std), axis=1)
    )
    cost = bce - kl
    acc = jnp.mean(((logits >= 0.0) == (y >= 0.5)).astype(jnp.float32))
    return cost, acc, z_mean, bce


def glorot(key, fan_in, fan_out):
    limit = jnp.sqrt(6.0 / (fan_in + fan_out))
    return jax.random.uniform(
        key, (fan_in, fan_out), dtype=jnp.float32, minval=-limit, maxval=limit
    )


# ----------------------------------------------------------------------------
# Deterministic setup + run
# ----------------------------------------------------------------------------
if __name__ == "__main__":
    num_nodes = 16       # n_samples
    num_features = 8     # input_dim
    hidden1_dim = 32     # args.hidden1
    hidden2_dim = 16     # args.hidden2

    key = jax.random.PRNGKey(0)
    k_feat, k_adj, k_w0, k_wm, k_ws, k_eps = jax.random.split(key, 6)

    features = jax.random.normal(k_feat, (num_nodes, num_features), dtype=jnp.float32)

    # Random symmetric binary adjacency with self-loops -> labels;
    # symmetrically normalized adjacency -> propagation matrix.
    a = (jax.random.uniform(k_adj, (num_nodes, num_nodes)) < 0.2).astype(jnp.float32)
    a = jnp.maximum(a, a.T)
    a_loops = jnp.minimum(a + jnp.eye(num_nodes, dtype=jnp.float32), 1.0)
    deg = jnp.sum(a_loops, axis=1)
    d_inv_sqrt = 1.0 / jnp.sqrt(deg)
    adj_norm = a_loops * d_inv_sqrt[:, None] * d_inv_sqrt[None, :]

    labels_dense = a_loops  # dense 0/1 labels (torch densifies the sparse coo labels)
    num_pos = float(jnp.sum(labels_dense))
    pos_weight = float(num_nodes * num_nodes - num_pos) / num_pos

    w0 = glorot(k_w0, num_features, hidden1_dim)
    wm = glorot(k_wm, hidden1_dim, hidden2_dim)
    ws = glorot(k_ws, hidden1_dim, hidden2_dim)

    # Deterministic stand-in for torch.randn([n_samples, hidden2]).
    eps = jax.random.normal(k_eps, (num_nodes, hidden2_dim), dtype=jnp.float32)

    # Hoist bf16 casts out of the per-call hot path (wrapper astype is then a no-op).
    adj_bf16 = adj_norm.astype(jnp.bfloat16)
    feat_bf16 = features.astype(jnp.bfloat16)
    w0_bf16 = w0.astype(jnp.bfloat16)
    wm_bf16 = wm.astype(jnp.bfloat16)
    ws_bf16 = ws.astype(jnp.bfloat16)
    labels_bf16 = labels_dense.astype(jnp.bfloat16)

    cost, accuracy, z_mean, log_like = gcn_vae_forward(
        feat_bf16, adj_bf16, labels_bf16, eps, w0_bf16, wm_bf16, ws_bf16, pos_weight
    )
    jax.block_until_ready((cost, accuracy, z_mean, log_like))

    assert z_mean.shape == (num_nodes, hidden2_dim)
    assert cost.shape == () and accuracy.shape == () and log_like.shape == ()
    assert bool(jnp.isfinite(cost)) and bool(jnp.isfinite(accuracy))
    assert bool(jnp.isfinite(log_like)) and bool(jnp.all(jnp.isfinite(z_mean)))

    # Tolerance check against a pure-JAX f32 reference (kernel uses bf16 MXU
    # operands with f32 accumulation -> generous tolerances).
    c_ref, a_ref, zm_ref, ll_ref = _reference_forward(
        features, adj_norm, labels_dense, eps, w0, wm, ws, pos_weight
    )
    assert bool(jnp.allclose(z_mean, zm_ref, rtol=5e-2, atol=5e-2))
    assert bool(jnp.allclose(cost, c_ref, rtol=5e-2, atol=5e-2))
    assert bool(jnp.allclose(log_like, ll_ref, rtol=5e-2, atol=5e-2))
    assert bool(jnp.abs(accuracy - a_ref) <= 5e-2)

    print("KERNEL_OK")
</pallas_src>

<mosaic_0001>
module attributes {stable_mosaic.version = 11 : i64} {
  func.func @_fused_gcn_vae_kernel(%arg0: i32, %arg1: i32, %arg2: memref<1xf32, #tpu.memory_space<smem>>, %arg3: memref<16x16xbf16, #tpu.memory_space<vmem>>, %arg4: memref<16x8xbf16, #tpu.memory_space<vmem>>, %arg5: memref<16x16xbf16, #tpu.memory_space<vmem>>, %arg6: memref<16x16xf32, #tpu.memory_space<vmem>>, %arg7: memref<8x32xbf16, #tpu.memory_space<vmem>>, %arg8: memref<32x32xbf16, #tpu.memory_space<vmem>>, %arg9: memref<16x16xf32, #tpu.memory_space<vmem>>, %arg10: memref<1xf32, #tpu.memory_space<smem>>, %arg11: memref<1xf32, #tpu.memory_space<smem>>, %arg12: memref<1xf32, #tpu.memory_space<smem>>, %arg13: memref<16x32xbf16, #tpu.memory_space<vmem>>, %arg14: memref<16x32xf32, #tpu.memory_space<vmem>>, %arg15: memref<16x32xbf16, #tpu.memory_space<vmem>>, %arg16: memref<16x16xf32, #tpu.memory_space<vmem>>, %arg17: memref<3xf32, #tpu.memory_space<smem>>) attributes {dimension_semantics = [#tpu.dimension_semantics<arbitrary>, #tpu.dimension_semantics<arbitrary>], iteration_bounds = array<i64: 3, 1>, scalar_prefetch = 0 : i64, scratch_operands = 5 : i64, tpu.core_type = #tpu.core_type<tc>, window_params = [{transform_indices = @transform_0, window_bounds = array<i64: 1>}, {pipeline_mode = #tpu.pipeline_mode<synchronous>, transform_indices = @transform_1, window_bounds = array<i64: 16, 16>}, {pipeline_mode = #tpu.pipeline_mode<synchronous>, transform_indices = @transform_2, window_bounds = array<i64: 16, 8>}, {transform_indices = @transform_3, window_bounds = array<i64: 16, 16>}, {pipeline_mode = #tpu.pipeline_mode<synchronous>, transform_indices = @transform_4, window_bounds = array<i64: 16, 16>}, {pipeline_mode = #tpu.pipeline_mode<synchronous>, transform_indices = @transform_5, window_bounds = array<i64: 8, 32>}, {pipeline_mode = #tpu.pipeline_mode<synchronous>, transform_indices = @transform_6, window_bounds = array<i64: 32, 32>}, {pipeline_mode = #tpu.pipeline_mode<synchronous>, transform_indices = @transform_7, window_bounds = array<i64: 16, 16>}, {transform_indices = @transform_8, window_bounds = array<i64: 1>}, {transform_indices = @transform_9, window_bounds = array<i64: 1>}, {transform_indices = @transform_10, window_bounds = array<i64: 1>}]} {
    %c16_i32 = arith.constant 16 : i32
    %0 = arith.muli %arg1, %c16_i32 : i32
    %1 = tpu.assume_multiple %0, 16 : i32
    %c0_i32 = arith.constant 0 : i32
    %2 = arith.cmpi eq, %arg0, %c0_i32 : i32
    %3 = arith.extui %2 : i1 to i32
    %c0_i32_0 = arith.constant 0 : i32
    %4 = arith.cmpi ne, %3, %c0_i32_0 : i32
    scf.if %4 {
      %c0_i32_3 = arith.constant 0 : i32
      %11 = arith.cmpi eq, %arg1, %c0_i32_3 : i32
      %12 = arith.extui %11 : i1 to i32
      %c0_i32_4 = arith.constant 0 : i32
      %13 = arith.cmpi ne, %12, %c0_i32_4 : i32
      scf.if %13 {
        %c0_9 = arith.constant 0 : index
        %c0_10 = arith.constant 0 : index
        %22 = vector.load %arg4[%c0_9, %c0_10] : memref<16x8xbf16, #tpu.memory_space<vmem>>, vector<16x8xbf16>
        %c0_11 = arith.constant 0 : index
        %c0_12 = arith.constant 0 : index
        %23 = vector.load %arg7[%c0_11, %c0_12] : memref<8x32xbf16, #tpu.memory_space<vmem>>, vector<8x32xbf16>
        %cst_13 = arith.constant dense<0.000000e+00> : vector<16x32xf32>
        %24 = tpu.matmul %22, %23, %cst_13 {dimension_numbers = #tpu.dot_dimension_numbers<[1], [0], [0], [1], [0, 0, 1, 1], [], []>} : vector<16x8xbf16>, vector<8x32xbf16>, vector<16x32xf32> -> vector<16x32xf32>
        %25 = arith.truncf %24 : vector<16x32xf32> to vector<16x32xbf16>
        %c0_14 = arith.constant 0 : index
        %c0_15 = arith.constant 0 : index
        %26 = vector.load %arg13[%c0_14, %c0_15] : memref<16x32xbf16, #tpu.memory_space<vmem>>, vector<16x32xbf16>
        tpu.vector_store %arg13[%c0_14, %c0_15], %25 {strides = array<i32>} : memref<16x32xbf16, #tpu.memory_space<vmem>>, vector<16x32xbf16>,
        %cst_16 = arith.constant 0.000000e+00 : f32
        %c0_17 = arith.constant 0 : index
        %27 = memref.load %arg17[%c0_17] : memref<3xf32, #tpu.memory_space<smem>>
        memref.store %cst_16, %arg17[%c0_17] : memref<3xf32, #tpu.memory_space<smem>>
        %cst_18 = arith.constant 0.000000e+00 : f32
        %c1 = arith.constant 1 : index
        %28 = memref.load %arg17[%c1] : memref<3xf32, #tpu.memory_space<smem>>
        memref.store %cst_18, %arg17[%c1] : memref<3xf32, #tpu.memory_space<smem>>
        %cst_19 = arith.constant 0.000000e+00 : f32
        %c2 = arith.constant 2 : index
        %29 = memref.load %arg17[%c2] : memref<3xf32, #tpu.memory_space<smem>>
        memref.store %cst_19, %arg17[%c2] : memref<3xf32, #tpu.memory_space<smem>>
      } else {
      }
      %14 = arith.index_cast %1 : i32 to index
      %c0 = arith.constant 0 : index
      %15 = vector.load %arg3[%14, %c0] : memref<16x16xbf16, #tpu.memory_space<vmem>>, vector<16x16xbf16>
      %c0_5 = arith.constant 0 : index
      %c0_6 = arith.constant 0 : index
      %16 = vector.load %arg13[%c0_5, %c0_6] : memref<16x32xbf16, #tpu.memory_space<vmem>>, vector<16x32xbf16>
      %cst = arith.constant dense<0.000000e+00> : vector<16x32xf32>
      %17 = tpu.matmul %15, %16, %cst {dimension_numbers = #tpu.dot_dimension_numbers<[1], [0], [0], [1], [0, 0, 1, 1], [], []>} : vector<16x16xbf16>, vector<16x32xbf16>, vector<16x32xf32> -> vector<16x32xf32>
      %cst_7 = arith.constant 0.000000e+00 : f32
      %18 = vector.broadcast %cst_7 : f32 to vector<16x32xf32>
      %19 = arith.maximumf %17, %18 : vector<16x32xf32>
      %20 = arith.index_cast %1 : i32 to index
      %c0_8 = arith.constant 0 : index
      %21 = vector.load %arg14[%20, %c0_8] : memref<16x32xf32, #tpu.memory_space<vmem>>, vector<16x32xf32>
      tpu.vector_store %arg14[%20, %c0_8], %19 {strides = array<i32>} : memref<16x32xf32, #tpu.memory_space<vmem>>, vector<16x32xf32>,
    } else {
    }
    %c1_i32 = arith.constant 1 : i32
    %5 = arith.cmpi eq, %arg0, %c1_i32 : i32
    %6 = arith.extui %5 : i1 to i32
    %c0_i32_1 = arith.constant 0 : i32
    %7 = arith.cmpi ne, %6, %c0_i32_1 : i32
    scf.if %7 {
      %c0_i32_3 = arith.constant 0 : i32
      %11 = arith.cmpi eq, %arg1, %c0_i32_3 : i32
      %12 = arith.extui %11 : i1 to i32
      %c0_i32_4 = arith.constant 0 : i32
      %13 = arith.cmpi ne, %12, %c0_i32_4 : i32
      scf.if %13 {
        %c0_15 = arith.constant 0 : index
        %c0_16 = arith.constant 0 : index
        %46 = vector.load %arg14[%c0_15, %c0_16] : memref<16x32xf32, #tpu.memory_space<vmem>>, vector<16x32xf32>
        %c0_17 = arith.constant 0 : index
        %c0_18 = arith.constant 0 : index
        %47 = vector.load %arg8[%c0_17, %c0_18] : memref<32x32xbf16, #tpu.memory_space<vmem>>, vector<32x32xbf16>
        %cst_19 = arith.constant dense<0.000000e+00> : vector<16x32xf32>
        %48 = tpu.matmul %46, %47, %cst_19 {dimension_numbers = #tpu.dot_dimension_numbers<[1], [0], [0], [1], [0, 0, 1, 1], [], []>} : vector<16x32xf32>, vector<32x32xbf16>, vector<16x32xf32> -> vector<16x32xf32>
        %49 = arith.truncf %48 : vector<16x32xf32> to vector<16x32xbf16>
        %c0_20 = arith.constant 0 : index
        %c0_21 = arith.constant 0 : index
        %50 = vector.load %arg15[%c0_20, %c0_21] : memref<16x32xbf16, #tpu.memory_space<vmem>>, vector<16x32xbf16>
        tpu.vector_store %arg15[%c0_20, %c0_21], %49 {strides = array<i32>} : memref<16x32xbf16, #tpu.memory_space<vmem>>, vector<16x32xbf16>,
      } else {
      }
      %14 = arith.index_cast %1 : i32 to index
      %c0 = arith.constant 0 : index
      %15 = vector.load %arg3[%14, %c0] : memref<16x16xbf16, #tpu.memory_space<vmem>>, vector<16x16xbf16>
      %c0_5 = arith.constant 0 : index
      %c0_6 = arith.constant 0 : index
      %16 = vector.load %arg15[%c0_5, %c0_6] : memref<16x32xbf16, #tpu.memory_space<vmem>>, vector<16x32xbf16>
      %cst = arith.constant dense<0.000000e+00> : vector<16x32xf32>
      %17 = tpu.matmul %15, %16, %cst {dimension_numbers = #tpu.dot_dimension_numbers<[1], [0], [0], [1], [0, 0, 1, 1], [], []>} : vector<16x16xbf16>, vector<16x32xbf16>, vector<16x32xf32> -> vector<16x32xf32>
      %18 = vector.extract_strided_slice %17 {offsets = [0, 0], sizes = [16, 16], strides = [1, 1]} : vector<16x32xf32> to vector<16x16xf32>
      %19 = vector.extract_strided_slice %17 {offsets = [0, 16], sizes = [16, 16], strides = [1, 1]} : vector<16x32xf32> to vector<16x16xf32>
      %20 = arith.index_cast %1 : i32 to index
      %c0_7 = arith.constant 0 : index
      %21 = vector.load %arg6[%20, %c0_7] : memref<16x16xf32, #tpu.memory_space<vmem>>, vector<16x16xf32>
      %22 = math.exp %19 : vector<16x16xf32>
      %23 = arith.mulf %21, %22 : vector<16x16xf32>
      %24 = arith.addf %18, %23 : vector<16x16xf32>
      %25 = arith.index_cast %1 : i32 to index
      %c0_8 = arith.constant 0 : index
      %26 = vector.load %arg9[%25, %c0_8] : memref<16x16xf32, #tpu.memory_space<vmem>>, vector<16x16xf32>
      tpu.vector_store %arg9[%25, %c0_8], %18 {strides = array<i32>} : memref<16x16xf32, #tpu.memory_space<vmem>>, vector<16x16xf32>,
      %27 = arith.index_cast %1 : i32 to index
      %c0_9 = arith.constant 0 : index
      %28 = vector.load %arg16[%27, %c0_9] : memref<16x16xf32, #tpu.memory_space<vmem>>, vector<16x16xf32>
      tpu.vector_store %arg16[%27, %c0_9], %24 {strides = array<i32>} : memref<16x16xf32, #tpu.memory_space<vmem>>, vector<16x16xf32>,
      %cst_10 = arith.constant 2.000000e+00 : f32
      %29 = vector.broadcast %cst_10 : f32 to vector<16x16xf32>
      %30 = arith.mulf %29, %19 : vector<16x16xf32>
      %cst_11 = arith.constant 1.000000e+00 : f32
      %31 = vector.broadcast %cst_11 : f32 to vector<16x16xf32>
      %32 = arith.addf %31, %30 : vector<16x16xf32>
      %33 = arith.mulf %18, %18 : vector<16x16xf32>
      %34 = arith.subf %32, %33 : vector<16x16xf32>
      %cst_12 = arith.constant 2.000000e+00 : f32
      %35 = vector.broadcast %cst_12 : f32 to vector<16x16xf32>
      %36 = arith.mulf %35, %19 : vector<16x16xf32>
      %37 = math.exp %36 : vector<16x16xf32>
      %38 = arith.subf %34, %37 : vector<16x16xf32>
      %39 = vector.shape_cast %38 : vector<16x16xf32> to vector<1x16x16xf32>
      %cst_13 = arith.constant dense<0.000000e+00> : vector<1xf32>
      %40 = vector.multi_reduction <add>, %39, %cst_13 [1, 2] : vector<1x16x16xf32> to vector<1xf32>
      %41 = vector.shape_cast %40 : vector<1xf32> to vector<1x1x1xf32>
      %42 = vector.extract %41[0, 0, 0] : f32 from vector<1x1x1xf32>
      %c2 = arith.constant 2 : index
      %43 = memref.load %arg17[%c2] : memref<3xf32, #tpu.memory_space<smem>>
      %44 = arith.addf %43, %42 : f32
      %c2_14 = arith.constant 2 : index
      %45 = memref.load %arg17[%c2_14] : memref<3xf32, #tpu.memory_space<smem>>
      memref.store %44, %arg17[%c2_14] : memref<3xf32, #tpu.memory_space<smem>>
    } else {
    }
    %c2_i32 = arith.constant 2 : i32
    %8 = arith.cmpi eq, %arg0, %c2_i32 : i32
    %9 = arith.extui %8 : i1 to i32
    %c0_i32_2 = arith.constant 0 : i32
    %10 = arith.cmpi ne, %9, %c0_i32_2 : i32
    scf.if %10 {
      %11 = arith.index_cast %1 : i32 to index
      %c0 = arith.constant 0 : index
      %12 = vector.load %arg16[%11, %c0] : memref<16x16xf32, #tpu.memory_space<vmem>>, vector<16x16xf32>
      %c0_3 = arith.constant 0 : index
      %c0_4 = arith.constant 0 : index
      %13 = vector.load %arg16[%c0_3, %c0_4] : memref<16x16xf32, #tpu.memory_space<vmem>>, vector<16x16xf32>
      %cst = arith.constant dense<0.000000e+00> : vector<16x16xf32>
      %14 = tpu.matmul %12, %13, %cst {dimension_numbers = #tpu.dot_dimension_numbers<[1], [1], [0], [0], [0, 0, 1, 0], [], []>} : vector<16x16xf32>, vector<16x16xf32>, vector<16x16xf32> -> vector<16x16xf32>
      %c0_5 = arith.constant 0 : index
      %c0_6 = arith.constant 0 : index
      %15 = vector.load %arg5[%c0_5, %c0_6] : memref<16x16xbf16, #tpu.memory_space<vmem>>, vector<16x16xbf16>
      %16 = arith.extf %15 : vector<16x16xbf16> to vector<16x16xf32>
      %c0_7 = arith.constant 0 : index
      %17 = memref.load %arg2[%c0_7] : memref<1xf32, #tpu.memory_space<smem>>
      %cst_8 = arith.constant 0.000000e+00 : f32
      %18 = vector.broadcast %cst_8 : f32 to vector<16x16xf32>
      %19 = arith.subf %18, %14 : vector<16x16xf32>
      %cst_9 = arith.constant 0.000000e+00 : f32
      %20 = vector.broadcast %cst_9 : f32 to vector<16x16xf32>
      %21 = arith.maximumf %19, %20 : vector<16x16xf32>
      %22 = math.absf %14 : vector<16x16xf32>
      %cst_10 = arith.constant 0.000000e+00 : f32
      %23 = vector.broadcast %cst_10 : f32 to vector<16x16xf32>
      %24 = arith.subf %23, %22 : vector<16x16xf32>
      %25 = math.exp %24 : vector<16x16xf32>
      %26 = math.log1p %25 : vector<16x16xf32>
      %27 = arith.addf %21, %26 : vector<16x16xf32>
      %28 = arith.addf %27, %14 : vector<16x16xf32>
      %29 = vector.broadcast %17 : f32 to vector<16x16xf32>
      %30 = arith.mulf %29, %16 : vector<16x16xf32>
      %31 = arith.mulf %30, %27 : vector<16x16xf32>
      %cst_11 = arith.constant 1.000000e+00 : f32
      %32 = vector.broadcast %cst_11 : f32 to vector<16x16xf32>
      %33 = arith.subf %32, %16 : vector<16x16xf32>
      %34 = arith.mulf %33, %28 : vector<16x16xf32>
      %35 = arith.addf %31, %34 : vector<16x16xf32>
      %cst_12 = arith.constant 0.000000e+00 : f32
      %36 = vector.broadcast %cst_12 : f32 to vector<16x16xf32>
      %37 = arith.cmpf oge, %14, %36 : vector<16x16xf32>
      %cst_13 = arith.constant 5.000000e-01 : f32
      %38 = vector.broadcast %cst_13 : f32 to vector<16x16xf32>
      %39 = arith.cmpf oge, %16, %38 : vector<16x16xf32>
      %40 = arith.xori %37, %39 : vector<16x16xi1>
      %cst_14 = arith.constant dense<true> : vector<16x16xi1>
      %41 = arith.xori %40, %cst_14 : vector<16x16xi1>
      %42 = arith.extui %41 : vector<16x16xi1> to vector<16x16xi32>
      %43 = arith.sitofp %42 : vector<16x16xi32> to vector<16x16xf32>
      %c0_15 = arith.constant 0 : index
      %44 = memref.load %arg17[%c0_15] : memref<3xf32, #tpu.memory_space<smem>>
      %45 = vector.shape_cast %35 : vector<16x16xf32> to vector<1x16x16xf32>
      %cst_16 = arith.constant dense<0.000000e+00> : vector<1xf32>
      %46 = vector.multi_reduction <add>, %45, %cst_16 [1, 2] : vector<1x16x16xf32> to vector<1xf32>
      %47 = vector.shape_cast %46 : vector<1xf32> to vector<1x1x1xf32>
      %48 = vector.extract %47[0, 0, 0] : f32 from vector<1x1x1xf32>
      %49 = arith.addf %44, %48 : f32
      %c0_17 = arith.constant 0 : index
      %50 = memref.load %arg17[%c0_17] : memref<3xf32, #tpu.memory_space<smem>>
      memref.store %49, %arg17[%c0_17] : memref<3xf32, #tpu.memory_space<smem>>
      %c1 = arith.constant 1 : index
      %51 = memref.load %arg17[%c1] : memref<3xf32, #tpu.memory_space<smem>>
      %52 = vector.shape_cast %43 : vector<16x16xf32> to vector<1x16x16xf32>
      %cst_18 = arith.constant dense<0.000000e+00> : vector<1xf32>
      %53 = vector.multi_reduction <add>, %52, %cst_18 [1, 2] : vector<1x16x16xf32> to vector<1xf32>
      %54 = vector.shape_cast %53 : vector<1xf32> to vector<1x1x1xf32>
      %55 = vector.extract %54[0, 0, 0] : f32 from vector<1x1x1xf32>
      %56 = arith.addf %51, %55 : f32
      %c1_19 = arith.constant 1 : index
      %57 = memref.load %arg17[%c1_19] : memref<3xf32, #tpu.memory_space<smem>>
      memref.store %56, %arg17[%c1_19] : memref<3xf32, #tpu.memory_space<smem>>
      %c0_i32_20 = arith.constant 0 : i32
      %58 = arith.cmpi eq, %arg1, %c0_i32_20 : i32
      %59 = arith.extui %58 : i1 to i32
      %c0_i32_21 = arith.constant 0 : i32
      %60 = arith.cmpi ne, %59, %c0_i32_21 : i32
      scf.if %60 {
        %c0_22 = arith.constant 0 : index
        %61 = memref.load %arg17[%c0_22] : memref<3xf32, #tpu.memory_space<smem>>
        %cst_23 = arith.constant 3.906250e-03 : f32
        %62 = arith.mulf %61, %cst_23 : f32
        %c2 = arith.constant 2 : index
        %63 = memref.load %arg17[%c2] : memref<3xf32, #tpu.memory_space<smem>>
        %cst_24 = arith.constant 5.000000e-01 : f32
        %64 = arith.mulf %cst_24, %63 : f32
        %cst_25 = arith.constant 3.906250e-03 : f32
        %65 = arith.mulf %64, %cst_25 : f32
        %c0_26 = arith.constant 0 : index
        %66 = memref.load %arg12[%c0_26] : memref<1xf32, #tpu.memory_space<smem>>
        memref.store %62, %arg12[%c0_26] : memref<1xf32, #tpu.memory_space<smem>>
        %67 = arith.subf %62, %65 : f32
        %c0_27 = arith.constant 0 : index
        %68 = memref.load %arg10[%c0_27] : memref<1xf32, #tpu.memory_space<smem>>
        memref.store %67, %arg10[%c0_27] : memref<1xf32, #tpu.memory_space<smem>>
        %c1_28 = arith.constant 1 : index
        %69 = memref.load %arg17[%c1_28] : memref<3xf32, #tpu.memory_space<smem>>
        %cst_29 = arith.constant 3.906250e-03 : f32
        %70 = arith.mulf %69, %cst_29 : f32
        %c0_30 = arith.constant 0 : index
        %71 = memref.load %arg11[%c0_30] : memref<1xf32, #tpu.memory_space<smem>>
        memref.store %70, %arg11[%c0_30] : memref<1xf32, #tpu.memory_space<smem>>
      } else {
      }
    } else {
    }
    return
  }
  func.func @transform_0(%arg0: i32, %arg1: i32) -> i32 {
    %c0_i32 = arith.constant 0 : i32
    %c0_i32_0 = arith.constant 0 : i32
    return %c0_i32 : i32
  }
  func.func @transform_1(%arg0: i32, %arg1: i32) -> (i32, i32) {
    %c0_i32 = arith.constant 0 : i32
    %c0_i32_0 = arith.constant 0 : i32
    %c0_i32_1 = arith.constant 0 : i32
    return %c0_i32, %c0_i32_0 : i32, i32
  }
  func.func @transform_2(%arg0: i32, %arg1: i32) -> (i32, i32) {
    %c0_i32 = arith.constant 0 : i32
    %c0_i32_0 = arith.constant 0 : i32
    %c0_i32_1 = arith.constant 0 : i32
    return %c0_i32, %c0_i32_0 : i32, i32
  }
  func.func @transform_3(%arg0: i32, %arg1: i32) -> (i32, i32) {
    %c2_i32 = arith.constant 2 : i32
    %0 = arith.cmpi eq, %arg0, %c2_i32 : i32
    %1 = arith.extui %0 : i1 to i32
    %2 = arith.muli %arg1, %1 : i32
    %c0_i32 = arith.constant 0 : i32
    %c0_i32_0 = arith.constant 0 : i32
    return %2, %c0_i32 : i32, i32
  }
  func.func @transform_4(%arg0: i32, %arg1: i32) -> (i32, i32) {
    %c0_i32 = arith.constant 0 : i32
    %c0_i32_0 = arith.constant 0 : i32
    %c0_i32_1 = arith.constant 0 : i32
    return %c0_i32, %c0_i32_0 : i32, i32
  }
  func.func @transform_5(%arg0: i32, %arg1: i32) -> (i32, i32) {
    %c0_i32 = arith.constant 0 : i32
    %c0_i32_0 = arith.constant 0 : i32
    %c0_i32_1 = arith.constant 0 : i32
    return %c0_i32, %c0_i32_0 : i32, i32
  }
  func.func @transform_6(%arg0: i32, %arg1: i32) -> (i32, i32) {
    %c0_i32 = arith.constant 0 : i32
    %c0_i32_0 = arith.constant 0 : i32
    %c0_i32_1 = arith.constant 0 : i32
    return %c0_i32, %c0_i32_0 : i32, i32
  }
  func.func @transform_7(%arg0: i32, %arg1: i32) -> (i32, i32) {
    %c0_i32 = arith.constant 0 : i32
    %c0_i32_0 = arith.constant 0 : i32
    %c0_i32_1 = arith.constant 0 : i32
    return %c0_i32, %c0_i32_0 : i32, i32
  }
  func.func @transform_8(%arg0: i32, %arg1: i32) -> i32 {
    %c0_i32 = arith.constant 0 : i32
    %c0_i32_0 = arith.constant 0 : i32
    return %c0_i32 : i32
  }
  func.func @transform_9(%arg0: i32, %arg1: i32) -> i32 {
    %c0_i32 = arith.constant 0 : i32
    %c0_i32_0 = arith.constant 0 : i32
    return %c0_i32 : i32
  }
  func.func @transform_10(%arg0: i32, %arg1: i32) -> i32 {
    %c0_i32 = arith.constant 0 : i32
    %c0_i32_0 = arith.constant 0 : i32
    return %c0_i32 : i32
  }
}

</mosaic_0001>

<bundles_post_ra>
// kernel: tpu_custom_call.1
= control target key start
LH: loop header
LB: loop body
LE: loop exit
PB: predicated region body
PF: predicated region fallthrough
CT: control target
= control target key end

     0   :  { %s1708_s0 = inlined_call_operand.<no memory space> [shape: f32[1], index: 0, kind: input, shape index: {}]   ;;  %s1709_s1 = inlined_call_operand.hbm [shape: bf16[16,16], index: 1, kind: input, shape index: {}]   ;;  %s1710_s2 = inlined_call_operand.vmem [shape: bf16[16,8], index: 2, kind: input, shape index: {}]   ;;  %s1711_s3 = inlined_call_operand.hbm [shape: bf16[16,16], index: 3, kind: input, shape index: {}]   ;;  %s1712_s4 = inlined_call_operand.vmem [shape: f32[16,16], index: 4, kind: input, shape index: {}]   ;;  %s1713_s5 = inlined_call_operand.hbm [shape: bf16[8,32], index: 5, kind: input, shape index: {}]   ;;  %s1714_s6 = inlined_call_operand.hbm [shape: bf16[32,32], index: 6, kind: input, shape index: {}]   ;;  %s1715_s7 = inlined_call_operand.hbm [shape: f32[16,16], index: 7, kind: output, shape index: {0}]   ;;  %s1716_s8 = inlined_call_operand.hbm [shape: f32[1], index: 8, kind: output, shape index: {1}]   ;;  %s1717_s9 = inlined_call_operand.hbm [shape: f32[1], index: 9, kind: output, shape index: {2}]   ;;  %s1718_s10 = inlined_call_operand.hbm [shape: f32[1], index: 10, kind: output, shape index: {3}]  }
   0x1   :  { %16 = sst [smem:[#allocation7]] %s1708_s0 }
   0x2   :  { %17 = vsyncpa [#allocation9], 0 }
   0x3   :  { %18 = vsyncpa [#allocation13], 0 }
   0x4   :  { %20 = vsyncpa [#allocation13 + $0x1], 0 }
   0x5   :  { %21 = vsyncpa [#allocation16], 0 }
   0x6   :  { %22 = vsyncpa [#allocation10], 0 }
   0x7   :  { %23 = vsyncpa [#allocation11], 0 }
   0x8   :  { %24 = vsyncpa [#allocation20], 0  ;;  %s1557_s15 = smov 0   ;;  %s1559_s16 = smov 0  }
   0x9   :  { %s1561_s17 = smov 0  }
   0xa LB: > { %s324_s19 = sshll.u32 %s1713_s5, 4  ;;  %s1576_s20 = sadd.s32 4294967295, %s1480_s17   ;;  %s1480_s17 = sphi %s1561_s17, %s30_s17   ;;  %s1476_s16 = sphi %s1559_s16, %s1722_s16   ;;  %s1472_s15 = sphi %s1557_s15, %s1721_s15   ;;  %s325_s19 = int_to_ptr.hbm [resolvable:$true] %s324_s19 }
   0xb   : > { %p1032_p0 = scmp.ge.s32.totalorder %s1480_s17, 1  ;;  %p289_p1 = scmp.lt.s32.totalorder %s1480_s17, 4 }
   0xc   : > { %p1166_p2 = scmp.eq.s32.totalorder %s1576_s20, 0  ;;  %s1482_s22 = smov [#allocation14]  }
   0xd   : > { %p1581_p3 = pnand %p1032_p0, %p289_p1  ;;  %s326_s23 = sshll.u32 %s1482_s22, 4  ;;  %s327_s23 = int_to_ptr.vmem [resolvable:$true] %s326_s23 }
   0xe   : > { %s42_s25 = sadd.s32 1, %s1476_s16  ;;  %s303_s28 = sshll.u32 %s1709_s1, 4  ;;  %s304_s28 = int_to_ptr.hbm [resolvable:$true] %s303_s28 }
   0xf   : > { %p1152_p4 = pneg %p1581_p3  ;;  %p44_p6 = scmp.ge.s32.totalorder %s42_s25, 3 }
  0x10   : > { %s1483_s29 = smov [#allocation8]   ;;  %s335_s13 = sshll.u32 %s1714_s6, 4  ;;  %s336_s13 = int_to_ptr.hbm [resolvable:$true] %s335_s13 }
  0x11   : > { %p1589_p5 = pnand %p1166_p2, %p1152_p4  ;;  %s1724_s25 = smov (%p44_p6, %s42_s25), 0 }
  0x12   : > { %s305_s30 = sshll.u32 %s1483_s29, 4  ;;  %s1484_s14 = smov 64   ;;  %s306_s30 = int_to_ptr.vmem [resolvable:$true] %s305_s30 }
  0x13   : > { %1158 = dma.hbm_to_vmem [thread:$0]  (!%p1589_p5), %s325_s19, 64, %s327_s23, [#allocation13]  }
  0x14   : > { %s1485_s0 = smov 4   ;;  %s1486_s18 = smov [#allocation15]  }
  0x15   : > { %1155 = dma.hbm_to_vmem [thread:$0]  (!%p1589_p5), %s304_s28, 128, %s306_s30, [#allocation9], %s1484_s14, %s1484_s14, %s1485_s0  }
  0x16   : > { %s337_s19 = sshll.u32 %s1486_s18, 4  ;;  %p1169_p7 = scmp.lt.s32.totalorder %s1480_s17, 3  ;;  %s338_s19 = int_to_ptr.vmem [resolvable:$true] %s337_s19 }
  0x17   : > { %p1170_p8 = scmp.eq.s32.totalorder %s1480_s17, 0  ;;  %s351_s22 = sand.u32 1, %s1480_s17  }
  0x18   : > { %1161 = dma.hbm_to_vmem [thread:$0]  (!%p1589_p5), %s336_s13, 256, %s338_s19, [#allocation16], %s1484_s14, %s1484_s14, %s1485_s0  }
  0x19   : > { %s364_s27 = sshll.u32 %s1711_s3, 4  ;;  %p1163_p9 = pnand %p1170_p8, %p1169_p7  ;;  %s365_s27 = int_to_ptr.hbm [resolvable:$true] %s364_s27 }
  0x1a   : > { %s1487_s29 = smov [#allocation12]   ;;  %s352_s12 = scalar_lea.sflag [#allocation13], %s351_s22 }
  0x1b   : > { %s366_s11 = sshll.u32 %s1487_s29, 4  ;;  %378 = sbr.rel (%p1581_p3) target bundleno = 1437 (0x59d), region = 48  ;;  %s367_s11 = int_to_ptr.vmem [resolvable:$true] %s366_s11 }
  0x1c   : > { %1165 = dma.hbm_to_vmem [thread:$0]  (!%p1163_p9), %s365_s27, 128, %s367_s11, %s352_s12, %s1484_s14, %s1484_s14, %s1485_s0  }
  0x20   : > { %1443 = dma.done.wait (%p1166_p2), [#allocation9], 128  }
  0x21   : > { %1445 = vsyncadd (%p1166_p2), [#allocation9], 4294967168  ;;  %s385_s24 = sand.u32 1, %s1576_s20  }
  0x22   : > { %s386_s28 = scalar_lea.sflag [#allocation13], %s385_s24 }
  0x23   : > { %1447 = dma.done.wait (%p1166_p2), %s386_s28, 128  }
  0x24   : > { %1449 = vsyncadd (%p1166_p2), %s386_s28, 4294967168 }
  0x25   : > { %1451 = dma.done.wait (%p1166_p2), [#allocation13], 64  }
  0x26   : > { %1453 = vsyncadd (%p1166_p2), [#allocation13], 4294967232 }
  0x27   : > { %1455 = dma.done.wait (%p1166_p2), [#allocation16], 256  }
  0x28   : > { %1457 = vsyncadd (%p1166_p2), [#allocation16], 4294967040  ;;  %p1043_p10 = scmp.ne.s32.totalorder %s1472_s15, 0 }
  0x29   : > { %s1488_s13 = smov (!%p1043_p10), 0.0  }
  0x2a   : > { %441 = sbr.rel (%p1043_p10) target bundleno = 336 (0x150), region = 68  ;;  %482 = sst [smem:[#allocation6]] (!%p1043_p10), %s1488_s13 }
  0x2b   : > { %484 = sst [smem:[#allocation6 + $0x1]] (!%p1043_p10), %s1488_s13 }
  0x2c   : > { %486 = sst [smem:[#allocation6 + $0x2]] (!%p1043_p10), %s1488_s13 }
  0x2f   : > { %v448_v0 = vld [vmem:[#allocation14] sm:$0xf]  ;;  %vm458_vm0 = vcmask 1043456   ;;  %v1099_v2 = vld [vmem:[%s1710_s2] sm:$0xff]  ;;  %vm454_vm1 = vcmask 64512   ;;  %vm478_vm2 = vcmask 257024  }
  0x30   : > { %v460_v1 = vsel %vm458_vm0, %v448_v0, 0  ;;  %v1100_v8 = vld [vmem:[#allocation8] sm:$0xff]  ;;  %vm506_vm3 = vcmask 130048   ;;  %vm527_vm4 = vcmask 261120  }
  0x31   : > { %469 = vmatpush.bf16.msra.mxu0 %v460_v1 }
  0x34   : > { %1048 = vmatmul.msk.bf16.vlgmr.msra.gmra.mxu0 %vm454_vm1, %v1099_v2 }
  0xb1   : > { %v471_v3 = vpop.f32.mrf.mxu0 }
  0xb2   : > { %v476_v4 = vpack.c.bf16 %v471_v3, %v471_v3 }
  0xb4   : > { %479 = vst.msk [vmem:[#allocation2] sm:$0xf] %vm478_vm2, %v476_v4 }
  0xb9   : > { %v473_v5 = vpop.f32.mrf.mxu0 }
  0xba   : > { %v477_v6 = vpack.c.bf16 %v473_v5, %v473_v5 }
  0xbc   : > { %480 = vst.msk [vmem:[#allocation2 + $0x4] sm:$0xf] %vm478_vm2, %v477_v6 }
  0xc3   : > { %v1101_v7 = vld [vmem:[#allocation2] sm:$0xff] }
  0xc4   : > { %517 = vmatpush.bf16.msra.mxu1 %v1101_v7 }
  0xc7   : > { %1057 = vmatmul.msk.bf16.vlgmr.msra.gmra.mxu1 %vm506_vm3, %v1100_v8 }
 0x144   : > { %v519_v9 = vpop.f32.mrf.mxu1 }
 0x145   : > { %v524_v10 = vmax.f32 %v519_v9, 0.0 }
 0x147   : > { %528 = vst.msk [vmem:[#allocation3] sm:$0xff] %vm527_vm4, %v524_v10 }
 0x14c   : > { %v521_v11 = vpop.f32.mrf.mxu1 }
 0x14d   : > { %v525_v12 = vmax.f32 %v521_v11, 0.0 }
 0x14f   : > { %529 = vst.msk [vmem:[#allocation3 + $0x8] sm:$0xff] %vm527_vm4, %v525_v12 }
 0x150 PF: > { %p1058_p11 = scmp.ne.s32.totalorder %s1472_s15, 1 }
 0x151   : > { %s1489_s14 = smov (!%p1058_p11), 16   ;;  %s1490_s0 = smov (!%p1058_p11), 112  }
 0x152   : > { %533 = sbr.rel (%p1058_p11) target bundleno = 1051 (0x41b), region = 76  ;;  %s1078_s26 = sld [smem:[#allocation6 + $0x2]] (!%p1058_p11) }
 0x157   : > { %v1103_v13 = vld [vmem:[#allocation15 + $0x8] sm:$0xff]  ;;  %v1102_v14 = vld [vmem:[#allocation15] sm:$0xff]  ;;  %vm556_vm5 = vcmask 261120   ;;  %vm580_vm6 = vcmask 257024   ;;  %vm602_vm7 = vcmask 130048   ;;  %v621_v58 = vld [vmem:[%s1712_s4] sm:$0xff] }
 0x158   : > { %1110 = vmatpush.bf16.msra.mxu2 %v1103_v13  ;;  %569 = vmatpush.bf16.msra.mxu0 %v1103_v13  ;;  %v539_v15 = vld [vmem:[#allocation3 + $0x8] sm:$0xff]  ;;  %v538_v16 = vld [vmem:[#allocation3] sm:$0xff] }
 0x159   : > { %v1104_v22 = vld [vmem:[#allocation8] sm:$0xff]  ;;  %v622_v43 = vld [vmem:[%s1712_s4 + $0x8] sm:$0xff] }
 0x15c   : > { %1111 = vmatpush.bf16.msra.mxu2 %v1102_v14  ;;  %570 = vmatpush.bf16.msra.mxu0 %v1102_v14 }
 0x15f   : > { %1068 = vmatmul.msk.f32.vlgmr.msra.gmra.mxu2 %vm556_vm5, %v539_v15  ;;  %1067 = vmatmul.msk.f32.vlgmr.msra.gmra.mxu0 %vm556_vm5, %v538_v16 }
 0x1dc   : > { %v572_v17 = vpop.f32.mrf.mxu0 }
 0x1dd   : > { %v578_v18 = vpack.c.bf16 %v572_v17, %v572_v17 }
 0x1df   : > { %581 = vst.msk [vmem:[#allocation4] sm:$0xf] %vm580_vm6, %v578_v18 }
 0x1e2   : > { %v575_v19 = vpop.f32.mrf.mxu2 }
 0x1e3   : > { %v579_v20 = vpack.c.bf16 %v575_v19, %v575_v19 }
 0x1e5   : > { %582 = vst.msk [vmem:[#allocation4 + $0x4] sm:$0xf] %vm580_vm6, %v579_v20 }
 0x1ec   : > { %v1105_v21 = vld [vmem:[#allocation4] sm:$0xff] }
 0x1ed   : > { %613 = vmatpush.bf16.msra.mxu1 %v1105_v21 }
 0x1f0   : > { %1077 = vmatmul.msk.bf16.vlgmr.msra.gmra.mxu1 %vm602_vm7, %v1104_v22 }
 0x26d   : > { %v615_v23 = vpop.f32.mrf.mxu1 }
 0x26e   : > { %640 = vst.msk [vmem:[#allocation17] sm:$0xff] %vm602_vm7, %v615_v23  ;;  %v649_v24 = vmul.f32 %v615_v23, %v615_v23  ;;  %v645_v29 = vmul.f32 2.0, %v615_v23  ;;  %v623_v52 = vmul.f32 1.442695, %v615_v23 }
 0x270   : > { %653 = vrot.lane.b32.xlu0 %v649_v24, %s1489_s14  ;;  %v661_v30 = vmul.f32 1.442695, %v645_v29  ;;  %v647_v32 = vadd.f32 1.0, %v645_v29 }
 0x275   : > { %v617_v25 = vpop.f32.mrf.mxu1 }
 0x276   : > { %v625_v26 = vmul.f32 1.442695, %v617_v25  ;;  %641 = vst.msk [vmem:[#allocation17 + $0x8] sm:$0xff] %vm602_vm7, %v617_v25  ;;  %v650_v27 = vmul.f32 %v617_v25, %v617_v25  ;;  %v646_v31 = vmul.f32 2.0, %v617_v25 }
 0x278   : > { %1224 = vpow2.f32 %v625_v26  ;;  %655 = vrot.lane.b32.xlu0 %v650_v27, %s1489_s14  ;;  %v663_v34 = vmul.f32 1.442695, %v646_v31  ;;  %v648_v38 = vadd.f32 1.0, %v646_v31 }
 0x279   : > { %1226 = vpow2.f32 %v661_v30 }
 0x27a   : > { %1228 = vpow2.f32 %v663_v34 }
 0x27b   : > { %1230 = vpow2.f32 %v623_v52 }
 0x27e   : > { %v1225_v28 = vpop.eup %1224 }
 0x27f   : > { %v1227_v36 = vpop.eup %1226 }
 0x280   : > { %631 = vrot.lane.b32.xlu0 %v1225_v28, %s1490_s0  ;;  %v1229_v41 = vpop.eup %1228 }
 0x281   : > { %v1231_v53 = vpop.eup %1230 }
 0x2e2   : > { %v654_v33 = vpop.permute.xlu0 %653 }
 0x2e3   : > { %v659_v35 = vsub.f32 %v647_v32, %v654_v33 }
 0x2e5   : > { %v665_v37 = vsub.f32 %v659_v35, %v1227_v36 }
 0x2e7   : > { %669 = vrot.lane.b32.xlu1 %v665_v37, %s1490_s0 }
 0x2ea   : > { %v656_v39 = vpop.permute.xlu0 %655 }
 0x2eb   : > { %v660_v40 = vsub.f32 %v648_v38, %v656_v39 }
 0x2ed   : > { %v666_v42 = vsub.f32 %v660_v40, %v1229_v41 }
 0x2ef   : > { %671 = vrot.lane.b32.xlu1 %v666_v42, %s1490_s0 }
 0x2f2   : > { %v632_v44 = vpop.permute.xlu0 %631 }
 0x2f3   : > { %v636_v45 = vmul.f32 %v632_v44, %v622_v43 }
 0x2f5   : > { %v638_v46 = vadd.f32 %v636_v45, %v617_v25 }
 0x2f7   : > { %644 = vst.msk [vmem:[#allocation5 + $0x8] sm:$0xff] %vm602_vm7, %v638_v46 }
 0x359   : > { %v670_v47 = vpop.permute.xlu1 %669 }
 0x35a   : > { %v675_v49 = vsel %vm602_vm7, %v670_v47, 0.0 }
 0x361   : > { %v672_v48 = vpop.permute.xlu1 %671 }
 0x362   : > { %v676_v50 = vsel %vm602_vm7, %v672_v48, 0.0 }
 0x363   : > { %v677_v51 = vadd.f32 %v676_v50, %v675_v49 }
 0x365   : > { %678 = vadd.xlane.f32.xlu2 %v677_v51 }
 0x37d   : > { %629 = vrot.lane.b32.xlu2 %v1231_v53, %s1490_s0 }
 0x3d8   : > { %v679_v54 = vpop.xlane.xlu2 %678 }
 0x3d9   : > { %v680_v55 = vrot.slane %v679_v54, 4 }
 0x3db   : > { %v681_v56 = vadd.f32 %v680_v55, %v679_v54 }
 0x3dd   : > { %v682_v57 = vrot.slane %v681_v56, 2 }
 0x3df   : > { %v683_v59 = vadd.f32 %v682_v57, %v681_v56 }
 0x3e0   : > { %v630_v60 = vpop.permute.xlu2 %629 }
 0x3e1   : > { %v635_v61 = vmul.f32 %v630_v60, %v621_v58  ;;  %v684_v62 = vrot.slane %v683_v59, 1 }
 0x3e3   : > { %v637_v63 = vadd.f32 %v635_v61, %v615_v23  ;;  %v685_v0 = vadd.f32 %v684_v62, %v683_v59 }
 0x3e5   : > { %643 = vst.msk [vmem:[#allocation5] sm:$0xff] %vm602_vm7, %v637_v63 }
 0x3e6   : > { %1114 = vpush %v685_v0 }
 0x417   : > { %s1115_s27 = spop %1114 }
 0x418   : > { %s688_s29 = sadd.f32 %s1115_s27, %s1078_s26 }
 0x41a   : > { %690 = sst [smem:[#allocation6 + $0x2]] %s688_s29 }
 0x41b PF: > { %p1079_p12 = scmp.ne.s32.totalorder %s1472_s15, 2 }
 0x41c   : > { %s740_s15 = sld [smem:[#allocation7]] (!%p1079_p12) }
 0x41d   : > { %694 = sbr.rel (%p1079_p12) target bundleno = 1420 (0x58c), region = 84  ;;  %s1087_s11 = sld [smem:[#allocation6 + $0x2]] (!%p1079_p12) }
 0x41e   : > { %s798_s12 = sld [smem:[#allocation6]] (!%p1079_p12) }
 0x41f   : > { %s1086_s21 = sld [smem:[#allocation6 + $0x1]] (!%p1079_p12) }
 0x422   : > { %v699_v1 = vld [vmem:[#allocation5 + $0x8] sm:$0xff]  ;;  %vm700_vm8 = vcmask 130048   ;;  %v698_v2 = vld [vmem:[#allocation5] sm:$0xff]  ;;  %v1107_v18 = vld [vmem:[#allocation12] sm:$0xff]   ;;  %v775_v29 = vstv %s740_s15  ;;  %vm1491_vm1 = vmmov 1   ;;  %v1492_v54 = vmov 0.0  }
 0x423   : > { %1080 = vmatpush.xpose.msk.msra.mxu0 %vm700_vm8, %v699_v1  ;;  %1112 = vmatpush.xpose.msk.msra.mxu1 %vm700_vm8, %v699_v1  ;;  %v1108_v26 = vunpack.c.l.bf16 %v1107_v18  ;;  %v1109_v34 = vunpack.c.h.bf16 %v1107_v18  ;;  %s837_s24 = smul.f32 0.5, %s1087_s11 }
 0x425   : > { %v776_v38 = vmul.f32 %v1108_v26, %v775_v29  ;;  %v780_v39 = vsub.f32 1.0, %v1108_v26  ;;  %v777_v41 = vmul.f32 %v1109_v34, %v775_v29  ;;  %v781_v42 = vsub.f32 1.0, %v1109_v34  ;;  %s838_s13 = smul.f32 0.00390625, %s837_s24 }
 0x426   : > { %vm788_vm12 = vcmp.ge.f32.partialorder %v1108_v26, 0.5  ;;  %vm789_vm14 = vcmp.ge.f32.partialorder %v1109_v34, 0.5 }
 0x427   : > { %1081 = vmatpush.xpose.msk.msra.mxu0 %vm700_vm8, %v698_v2  ;;  %1113 = vmatpush.xpose.msk.msra.mxu1 %vm700_vm8, %v698_v2 }
 0x42a   : > { %1082 = vmatmul.msk.f32.vlgmr.msra.gmra.mxu0 %vm700_vm8, %v698_v2  ;;  %1083 = vmatmul.msk.f32.vlgmr.msra.gmra.mxu1 %vm700_vm8, %v699_v1 }
 0x4a7   : > { %v730_v3 = vpop.f32.mrf.mxu0  ;;  %v733_v4 = vpop.f32.mrf.mxu1 }
 0x4a8   : > { %v745_v5 = vand.u32 2147483647, %v730_v3  ;;  %v746_v6 = vand.u32 2147483647, %v733_v4  ;;  %v741_v19 = vsub.f32 0.0, %v730_v3  ;;  %v742_v22 = vsub.f32 0.0, %v733_v4 }
 0x4a9   : > { %vm786_vm11 = vcmp.ge.f32.partialorder %v730_v3, 0.0  ;;  %vm787_vm13 = vcmp.ge.f32.partialorder %v733_v4, 0.0 }
 0x4aa   : > { %v747_v7 = vsub.f32 0.0, %v745_v5  ;;  %v748_v8 = vsub.f32 0.0, %v746_v6  ;;  %v743_v30 = vmax.f32 %v741_v19, 0.0  ;;  %v744_v35 = vmax.f32 %v742_v22, 0.0  ;;  %vm790_vm15 = vmxor %vm786_vm11, %vm788_vm12 }
 0x4ab   : > { %vm791_vm0 = vmxor %vm787_vm13, %vm789_vm14 }
 0x4ac   : > { %v749_v9 = vmul.f32 1.442695, %v747_v7  ;;  %v751_v10 = vmul.f32 1.442695, %v748_v8  ;;  %vm792_vm2 = vmxor %vm790_vm15, %vm1491_vm1 }
 0x4ad   : > { %vm793_vm3 = vmxor %vm791_vm0, %vm1491_vm1  ;;  %v1084_v55 = vsel %vm792_vm2, 1.0, %v1492_v54 }
 0x4ae   : > { %1232 = vpow2.f32 %v749_v9  ;;  %v1085_v56 = vsel %vm793_vm3, 1.0, %v1492_v54  ;;  %v815_v57 = vsel %vm700_vm8, %v1084_v55, 0.0 }
 0x4af   : > { %1234 = vpow2.f32 %v751_v10  ;;  %v816_v58 = vsel %vm700_vm8, %v1085_v56, 0.0 }
 0x4b0   : > { %v817_v59 = vadd.f32 %v816_v58, %v815_v57 }
 0x4b4   : > { %v1233_v11 = vpop.eup %1232 }
 0x4b5   : > { %v1235_v12 = vpop.eup %1234  ;;  %v753_v13 = vadd.f32 1.0, %v1233_v11  ;;  %v756_v14 = vmul.f32 -0.5, %v1233_v11  ;;  %v759_v20 = vand.u32 2147483647, %v1233_v11 }
 0x4b6   : > { %v762_v15 = vadd.f32 1.0, %v1235_v12  ;;  %v765_v16 = vmul.f32 -0.5, %v1235_v12  ;;  %v768_v23 = vand.u32 2147483647, %v1235_v12 }
 0x4b7   : > { %1236 = vlog2.f32 %v753_v13  ;;  %v757_v17 = vadd.f32 1.0, %v756_v14  ;;  %vm760_vm9 = vcmp.lt.f32.partialorder %v759_v20, 0.0004427343 }
 0x4b8   : > { %1238 = vlog2.f32 %v762_v15  ;;  %v766_v21 = vadd.f32 1.0, %v765_v16  ;;  %vm769_vm10 = vcmp.lt.f32.partialorder %v768_v23, 0.0004427343 }
 0x4b9   : > { %v758_v28 = vmul.f32 %v1233_v11, %v757_v17 }
 0x4ba   : > { %v767_v32 = vmul.f32 %v1235_v12, %v766_v21 }
 0x4bd   : > { %v1237_v24 = vpop.eup %1236 }
 0x4be   : > { %v1239_v25 = vpop.eup %1238  ;;  %v755_v27 = vmul.f32 0.6931472, %v1237_v24 }
 0x4bf   : > { %v764_v31 = vmul.f32 0.6931472, %v1239_v25 }
 0x4c0   : > { %v761_v33 = vsel %vm760_vm9, %v758_v28, %v755_v27 }
 0x4c1   : > { %v771_v36 = vadd.f32 %v761_v33, %v743_v30  ;;  %v770_v37 = vsel %vm769_vm10, %v767_v32, %v764_v31 }
 0x4c2   : > { %v772_v40 = vadd.f32 %v770_v37, %v744_v35 }
 0x4c3   : > { %v773_v43 = vadd.f32 %v771_v36, %v730_v3  ;;  %v778_v45 = vmul.f32 %v776_v38, %v771_v36 }
 0x4c4   : > { %v774_v44 = vadd.f32 %v772_v40, %v733_v4  ;;  %v779_v47 = vmul.f32 %v777_v41, %v772_v40 }
 0x4c5   : > { %v782_v46 = vmul.f32 %v780_v39, %v773_v43 }
 0x4c6   : > { %v783_v48 = vmul.f32 %v781_v42, %v774_v44 }
 0x4c7   : > { %v784_v49 = vadd.f32 %v782_v46, %v778_v45 }
 0x4c8   : > { %v785_v50 = vadd.f32 %v783_v48, %v779_v47 }
 0x4c9   : > { %v799_v51 = vsel %vm700_vm8, %v784_v49, 0.0 }
 0x4ca   : > { %v800_v52 = vsel %vm700_vm8, %v785_v50, 0.0 }
 0x4cb   : > { %v801_v53 = vadd.f32 %v800_v52, %v799_v51 }
 0x4cd   : > { %802 = vadd.xlane.f32.xlu0 %v801_v53 }
 0x4d5   : > { %818 = vadd.xlane.f32.xlu0 %v817_v59 }
 0x540   : > { %v803_v60 = vpop.xlane.xlu0 %802 }
 0x541   : > { %v804_v61 = vrot.slane %v803_v60, 4 }
 0x543   : > { %v805_v62 = vadd.f32 %v804_v61, %v803_v60 }
 0x545   : > { %v806_v63 = vrot.slane %v805_v62, 2 }
 0x547   : > { %v807_v0 = vadd.f32 %v806_v63, %v805_v62 }
 0x548   : > { %v819_v1 = vpop.xlane.xlu0 %818 }
 0x549   : > { %v820_v2 = vrot.slane %v819_v1, 4  ;;  %v808_v3 = vrot.slane %v807_v0, 1 }
 0x54b   : > { %v821_v4 = vadd.f32 %v820_v2, %v819_v1  ;;  %v809_v5 = vadd.f32 %v808_v3, %v807_v0 }
 0x54d   : > { %v822_v6 = vrot.slane %v821_v4, 2  ;;  %1116 = vpush %v809_v5 }
 0x54f   : > { %v823_v7 = vadd.f32 %v822_v6, %v821_v4 }
 0x551   : > { %v824_v8 = vrot.slane %v823_v7, 1 }
 0x553   : > { %v825_v9 = vadd.f32 %v824_v8, %v823_v7 }
 0x555   : > { %1118 = vpush %v825_v9 }
 0x57e   : > { %s1117_s28 = spop %1116 }
 0x57f   : > { %s811_s30 = sadd.f32 %s1117_s28, %s798_s12 }
 0x581   : > { %813 = sst [smem:[#allocation6]] %s811_s30  ;;  %s835_s14 = smul.f32 0.00390625, %s811_s30 }
 0x583   : > { %840 = sst [smem:[#allocation21]] %s835_s14 }
 0x584   : > { %s841_s0 = ssub.f32 %s835_s14, %s838_s13 }
 0x586   : > { %843 = sst [smem:[#allocation18]] %s841_s0  ;;  %s1119_s18 = spop %1118 }
 0x587   : > { %s827_s19 = sadd.f32 %s1119_s18, %s1086_s21 }
 0x589   : > { %829 = sst [smem:[#allocation6 + $0x1]] %s827_s19  ;;  %s845_s22 = smul.f32 0.00390625, %s827_s19 }
 0x58b   : > { %847 = sst [smem:[#allocation19]] %s845_s22 }
 0x58c PF: > { %p1175_p13 = scmp.eq.s32.totalorder %s1576_s20, 2  ;;  %s878_s27 = sshll.u32 %s1717_s9, 4  ;;  %s879_s27 = int_to_ptr.hbm [resolvable:$true] %s878_s27 }
 0x58d   : > { %s1493_s29 = smov [#allocation19]   ;;  %s1494_s15 = smov [#allocation17]  }
 0x58e   : > { %1141 = dma.smem_to_hbm (%p1175_p13), %s1493_s29, 16, %s879_s27, [#allocation20]  }
 0x58f   : > { %s853_s11 = sshll.u32 %s1494_s15, 4  ;;  %s855_s28 = sshll.u32 %s1715_s7, 4  ;;  %s854_s11 = int_to_ptr.vmem [resolvable:$true] %s853_s11  ;;  %s856_s28 = int_to_ptr.hbm [resolvable:$true] %s855_s28 }
 0x590   : > { %s1495_s21 = smov 128   ;;  %s1496_s30 = smov 8  }
 0x591   : > { %1137 = dma.vmem_to_hbm [thread:$0]  (%p1175_p13), %s854_s11, 256, %s856_s28, [#allocation10], %s1495_s21, %s1495_s21, %s1496_s30  }
 0x592   : > { %s868_s0 = sshll.u32 %s1716_s8, 4  ;;  %s888_s22 = sshll.u32 %s1718_s10, 4  ;;  %s869_s0 = int_to_ptr.hbm [resolvable:$true] %s868_s0  ;;  %s889_s22 = int_to_ptr.hbm [resolvable:$true] %s888_s22 }
 0x593   : > { %s1497_s23 = smov [#allocation18]   ;;  %s1498_s26 = smov [#allocation21]  }
 0x594   : > { %1139 = dma.smem_to_hbm (%p1175_p13), %s1497_s23, 16, %s869_s0, [#allocation11]  }
 0x595   : > { %1143 = dma.smem_to_hbm (%p1175_p13), %s1498_s26, 16, %s889_s22, [#allocation20]  }
 0x596   : > { %1459 = dma.done.wait (%p1175_p13), [#allocation10], 256  }
 0x597   : > { %1461 = vsyncadd (%p1175_p13), [#allocation10], 4294967040 }
 0x598   : > { %1463 = dma.done.wait (%p1175_p13), [#allocation11], 16  }
 0x599   : > { %1465 = vsyncadd (%p1175_p13), [#allocation11], 4294967280 }
 0x59a   : > { %1467 = dma.done.wait (%p1175_p13), [#allocation20], 32  }
 0x59b   : > { %1469 = vsyncadd (%p1175_p13), [#allocation20], 4294967264 }
 0x59c   : > { %912 = sfence }
 0x59d PF: > { %s30_s17 = sadd.s32 1, %s1480_s17   ;;  %s1721_s15 = smov %s1476_s16 }
 0x59e   : > { %p27_p0 = scmp.ge.s32.totalorder %s30_s17, 5   ;;  %s1722_s16 = smov %s1724_s25 }
 0x5a0   :  { %29 = sbr.rel (!%p27_p0) target bundleno = 10 (0xa), region = 163 }
 0x5a5   :  { %918 = vsyncpa [#allocation9], 1 }
 0x5a6   :  { %920 = vsyncpa [#allocation9 + $0x1], 1 }
 0x5a7   :  { %921 = vsyncpa [#allocation13], 1 }
 0x5a8   :  { %923 = vsyncpa [#allocation13 + $0x1], 1 }
 0x5a9   :  { %924 = vsyncpa [#allocation16], 1 }
 0x5aa   :  { %925 = vsyncpa [#allocation10], 1 }
 0x5ab   :  { %927 = vsyncpa [#allocation10 + $0x1], 1 }
 0x5ac   :  { %928 = vsyncpa [#allocation11], 1 }
 0x5ad   :  { %930 = vsyncpa [#allocation11 + $0x1], 1 }
 0x5ae   :  { %931 = vsyncpa [#allocation20], 1 }

</bundles_post_ra>
